<compile_context>
chip_gen: v5e
topology: v5e:2x2
jax: 0.10.0
libtpu: 0.0.40
codegen_flags: <defaults>
</compile_context>

<pallas_src>
import jax
import jax.numpy as jnp
from jax.experimental import pallas as pl
from jax.experimental.pallas import tpu as pltpu

EPS = 1e-5  # PyTorch BatchNorm2d default


def _round_up(x, m):
    return (x + m - 1) // m * m


def conv2d_batchnorm_relu(x, weight, bias=None, stride=(1, 1), padding=0,
                          activation="relu"):
    """x: [N, C, H, W] f32; weight: [F, C, KH, KW] f32.

    Returns [N, F, OH, OW] f32 (NCHW), matching the PyTorch module's forward
    (training-mode batch statistics, affine=False).
    """
    # (conv + b) - mean(conv + b) == conv - mean(conv): the conv bias is a
    # mathematical no-op under affine=False BatchNorm -> drop it.
    del bias

    N, C, H, W = x.shape
    F_out, _, KH, KW = weight.shape
    sh, sw = stride
    if isinstance(padding, (tuple, list)):
        ph, pw = padding
    else:
        ph = pw = int(padding)

    if ph > 0 or pw > 0:
        x = jnp.pad(x, ((0, 0), (0, 0), (ph, ph), (pw, pw)))
    Hp, Wp = H + 2 * ph, W + 2 * pw
    OH = (Hp - KH) // sh + 1
    OW = (Wp - KW) // sw + 1
    assert OH > 0 and OW > 0, "kernel larger than (padded) input"

    # ---- layout / padding ---------------------------------------------------
    # F on the sublane axis: pad to 8 (not 128). Tile F if it is very large.
    F_pad = _round_up(F_out, 8)
    if F_pad > 512:
        F_pad = _round_up(F_out, 256)
        tile_f = 256
    else:
        tile_f = F_pad
    nf = F_pad // tile_f

    HW = Hp * Wp
    HWO = _round_up(HW, 128)                        # lane-padded output grid
    halo = (KH - 1) * Wp + (KW - 1)                 # max shift of the slices
    HWI = _round_up(HWO + halo, 128)                # lane-padded input window

    x_flat = x.astype(jnp.bfloat16).reshape(N, C, HW)
    x_flat = jnp.pad(x_flat, ((0, 0), (0, 0), (0, HWI - HW)))      # zero halo

    # w_r[kh*KW + kw] = weight[:, :, kh, kw]  -> [KH*KW, F_pad, C] bf16
    w_r = weight.transpose(2, 3, 0, 1).reshape(KH * KW, F_out, C)
    w_r = jnp.pad(w_r, ((0, 0), (0, F_pad - F_out), (0, 0))).astype(jnp.bfloat16)

    # Stats mask over the stride-1 full grid: 1.0 at true output positions.
    p = jnp.arange(HWO)
    hh, ww = p // Wp, p % Wp
    valid = ((p < HW) & (hh % sh == 0) & (hh // sh < OH)
             & (ww % sw == 0) & (ww // sw < OW))
    mask = valid.astype(jnp.float32)[None, :]       # [1, HWO]

    count = float(N * OH * OW)
    apply_relu = (activation == "relu")
    conv_dtype = jnp.bfloat16                       # halves intermediate HBM traffic

    # VMEM budget (double-buffered blocks + f32 accumulator), capped well under
    # v7x's 64 MiB physical VMEM.
    # TODO(synk): spatially tile huge images (whole-image blocks assumed here).
    est = (2 * C * HWI * 2 + 2 * KH * KW * F_pad * C * 2
           + 2 * tile_f * HWO * 2 + 2 * tile_f * HWO * 4
           + tile_f * HWO * 4 + 2 * HWO * 4 + 1 << 16)
    vmem_limit = int(min(max(2 * est, 32 << 20), 48 << 20))

    # -------- phase 1: fused-im2col conv + per-image partial statistics ------
    def conv_stats_kernel(x_ref, w_ref, mask_ref, conv_ref, s1_ref, s2_ref):
        acc = jnp.zeros((tile_f, HWO), jnp.float32)
        for kh in range(KH):                         # static, small
            for kw in range(KW):
                off = kh * Wp + kw
                xs = x_ref[0, :, pl.ds(off, HWO)]    # [C, HWO] bf16 (lane shift)
                acc = acc + jnp.dot(w_ref[kh * KW + kw], xs,
                                    preferred_element_type=jnp.float32)
        conv_ref[0] = acc.astype(conv_dtype)
        cm = acc * mask_ref[...]                     # zero invalid positions
        s1_ref[0] = jnp.sum(cm, axis=-1, keepdims=True)         # [tile_f, 1]
        s2_ref[0] = jnp.sum(cm * acc, axis=-1, keepdims=True)   # [tile_f, 1]

    conv_out, s1, s2 = pl.pallas_call(
        conv_stats_kernel,
        out_shape=(jax.ShapeDtypeStruct((N, F_pad, HWO), conv_dtype),
                   jax.ShapeDtypeStruct((N, F_pad, 1), jnp.float32),
                   jax.ShapeDtypeStruct((N, F_pad, 1), jnp.float32)),
        grid=(N, nf),
        in_specs=[
            pl.BlockSpec((1, C, HWI), lambda n, f: (n, 0, 0)),        # resident across f
            pl.BlockSpec((KH * KW, tile_f, C), lambda n, f: (0, f, 0)),
            pl.BlockSpec((1, HWO), lambda n, f: (0, 0)),
        ],
        out_specs=(pl.BlockSpec((1, tile_f, HWO), lambda n, f: (n, f, 0)),
                   pl.BlockSpec((1, tile_f, 1), lambda n, f: (n, f, 0)),
                   pl.BlockSpec((1, tile_f, 1), lambda n, f: (n, f, 0))),
        compiler_params=pltpu.CompilerParams(
            dimension_semantics=("parallel", "parallel"),
            vmem_limit_bytes=vmem_limit),
    )(x_flat, w_r, mask)

    # -------- tiny cross-image stats reduction + BN coefficient folding ------
    s1 = jnp.sum(s1, axis=0)[:, 0]                   # [F_pad]
    s2 = jnp.sum(s2, axis=0)[:, 0]
    mean = s1 / count
    var = jnp.maximum(s2 / count - mean * mean, 0.0)  # guard f32 cancellation
    inv_std = jax.lax.rsqrt(var + EPS)
    scale = inv_std.reshape(F_pad, 1).astype(jnp.float32)
    shift = (-mean * inv_std).reshape(F_pad, 1).astype(jnp.float32)

    # -------- phase 2: pure-VPU normalize (+ReLU), lane-dense writes ---------
    def norm_kernel(conv_ref, scale_ref, shift_ref, o_ref):
        y = conv_ref[0].astype(jnp.float32) * scale_ref[...] + shift_ref[...]
        if apply_relu:
            y = jnp.maximum(y, 0.0)
        o_ref[0] = y.astype(o_ref.dtype)

    out_flat = pl.pallas_call(
        norm_kernel,
        out_shape=jax.ShapeDtypeStruct((N, F_pad, HWO), jnp.float32),
        grid=(N, nf),
        in_specs=[
            pl.BlockSpec((1, tile_f, HWO), lambda n, f: (n, f, 0)),
            pl.BlockSpec((tile_f, 1), lambda n, f: (f, 0)),
            pl.BlockSpec((tile_f, 1), lambda n, f: (f, 0)),
        ],
        out_specs=pl.BlockSpec((1, tile_f, HWO), lambda n, f: (n, f, 0)),
        compiler_params=pltpu.CompilerParams(
            dimension_semantics=("parallel", "parallel"),
            vmem_limit_bytes=vmem_limit),
    )(conv_out, scale, shift)

    # Slice the valid (strided) positions; channel-major layout means NO
    # transpose is needed to get NCHW.
    out = out_flat[:, :F_out, :HW].reshape(N, F_out, Hp, Wp)
    out = out[:, :, ::sh, ::sw][:, :, :OH, :OW]
    return out


if __name__ == "__main__":
    key = jax.random.PRNGKey(0)
    k_x, k_w, k_b = jax.random.split(key, 3)

    # Module config: input_features=4, num_of_filters=8, kernel_size=(2,2),
    # stride=(1,1), padding=0, activation='relu'.
    N, C, H, W = 2, 4, 16, 16
    F_out, KH, KW = 8, 2, 2

    x = jax.random.normal(k_x, (N, C, H, W), dtype=jnp.float32)
    fan_in = C * KH * KW
    bound = 1.0 / (fan_in ** 0.5)
    weight = jax.random.uniform(k_w, (F_out, C, KH, KW),
                                minval=-bound, maxval=bound, dtype=jnp.float32)
    bias = jax.random.uniform(k_b, (F_out,),
                              minval=-bound, maxval=bound, dtype=jnp.float32)

    out = conv2d_batchnorm_relu(x, weight, bias, stride=(1, 1), padding=0,
                                activation="relu")
    out = jax.block_until_ready(out)
    assert out.shape == (N, F_out, H - KH + 1, W - KW + 1), out.shape

    # Pure-JAX f32 reference: conv (+bias) -> batch-stats BN -> ReLU.
    conv_ref = jax.lax.conv_general_dilated(
        x, weight, window_strides=(1, 1), padding="VALID",
        dimension_numbers=("NCHW", "OIHW", "NCHW")) + bias[None, :, None, None]
    mean_ref = conv_ref.mean(axis=(0, 2, 3), keepdims=True)
    var_ref = conv_ref.var(axis=(0, 2, 3), keepdims=True)
    ref = jnp.maximum((conv_ref - mean_ref) * jax.lax.rsqrt(var_ref + EPS), 0.0)
    max_err = float(jnp.max(jnp.abs(out - ref)))
    assert max_err < 0.1, f"max abs error {max_err}"

    print("KERNEL_OK")
</pallas_src>

<mosaic_0001>
module attributes {stable_mosaic.version = 11 : i64} {
  func.func @conv_stats_kernel(%arg0: i32, %arg1: i32, %arg2: memref<1x4x384xbf16, #tpu.memory_space<vmem>>, %arg3: memref<4x8x4xbf16, #tpu.memory_space<vmem>>, %arg4: memref<1x256xf32, #tpu.memory_space<vmem>>, %arg5: memref<1x8x256xbf16, #tpu.memory_space<vmem>>, %arg6: memref<1x8x1xf32, #tpu.memory_space<vmem>>, %arg7: memref<1x8x1xf32, #tpu.memory_space<vmem>>) attributes {dimension_semantics = [#tpu.dimension_semantics<parallel>, #tpu.dimension_semantics<parallel>], iteration_bounds = array<i64: 2, 1>, scalar_prefetch = 0 : i64, scratch_operands = 0 : i64, tpu.core_type = #tpu.core_type<tc>, window_params = [{transform_indices = @transform_0, window_bounds = array<i64: 1, 4, 384>}, {transform_indices = @transform_1, window_bounds = array<i64: 4, 8, 4>}, {pipeline_mode = #tpu.pipeline_mode<synchronous>, transform_indices = @transform_2, window_bounds = array<i64: 1, 256>}, {transform_indices = @transform_3, window_bounds = array<i64: 1, 8, 256>}, {transform_indices = @transform_4, window_bounds = array<i64: 1, 8, 1>}, {transform_indices = @transform_5, window_bounds = array<i64: 1, 8, 1>}]} {
    %cst = arith.constant 0.000000e+00 : f32
    %0 = vector.broadcast %cst : f32 to vector<8x256xf32>
    %c0 = arith.constant 0 : index
    %c0_0 = arith.constant 0 : index
    %c0_1 = arith.constant 0 : index
    %1 = vector.load %arg2[%c0, %c0_0, %c0_1] : memref<1x4x384xbf16, #tpu.memory_space<vmem>>, vector<1x4x256xbf16>
    %2 = vector.shape_cast %1 : vector<1x4x256xbf16> to vector<4x256xbf16>
    %c0_2 = arith.constant 0 : index
    %c0_3 = arith.constant 0 : index
    %c0_4 = arith.constant 0 : index
    %3 = vector.load %arg3[%c0_2, %c0_3, %c0_4] : memref<4x8x4xbf16, #tpu.memory_space<vmem>>, vector<1x8x4xbf16>
    %4 = vector.shape_cast %3 : vector<1x8x4xbf16> to vector<8x4xbf16>
    %cst_5 = arith.constant dense<0.000000e+00> : vector<8x256xf32>
    %5 = tpu.matmul %4, %2, %cst_5 {dimension_numbers = #tpu.dot_dimension_numbers<[1], [0], [0], [1], [0, 0, 1, 1], [], []>} : vector<8x4xbf16>, vector<4x256xbf16>, vector<8x256xf32> -> vector<8x256xf32>
    %6 = arith.addf %0, %5 : vector<8x256xf32>
    %c0_6 = arith.constant 0 : index
    %c0_7 = arith.constant 0 : index
    %c1 = arith.constant 1 : index
    %7 = vector.load %arg2[%c0_6, %c0_7, %c1] : memref<1x4x384xbf16, #tpu.memory_space<vmem>>, vector<1x4x256xbf16>
    %8 = vector.shape_cast %7 : vector<1x4x256xbf16> to vector<4x256xbf16>
    %c1_8 = arith.constant 1 : index
    %c0_9 = arith.constant 0 : index
    %c0_10 = arith.constant 0 : index
    %9 = vector.load %arg3[%c1_8, %c0_9, %c0_10] : memref<4x8x4xbf16, #tpu.memory_space<vmem>>, vector<1x8x4xbf16>
    %10 = vector.shape_cast %9 : vector<1x8x4xbf16> to vector<8x4xbf16>
    %cst_11 = arith.constant dense<0.000000e+00> : vector<8x256xf32>
    %11 = tpu.matmul %10, %8, %cst_11 {dimension_numbers = #tpu.dot_dimension_numbers<[1], [0], [0], [1], [0, 0, 1, 1], [], []>} : vector<8x4xbf16>, vector<4x256xbf16>, vector<8x256xf32> -> vector<8x256xf32>
    %12 = arith.addf %6, %11 : vector<8x256xf32>
    %c0_12 = arith.constant 0 : index
    %c0_13 = arith.constant 0 : index
    %c16 = arith.constant 16 : index
    %13 = vector.load %arg2[%c0_12, %c0_13, %c16] : memref<1x4x384xbf16, #tpu.memory_space<vmem>>, vector<1x4x256xbf16>
    %14 = vector.shape_cast %13 : vector<1x4x256xbf16> to vector<4x256xbf16>
    %c2 = arith.constant 2 : index
    %c0_14 = arith.constant 0 : index
    %c0_15 = arith.constant 0 : index
    %15 = vector.load %arg3[%c2, %c0_14, %c0_15] : memref<4x8x4xbf16, #tpu.memory_space<vmem>>, vector<1x8x4xbf16>
    %16 = vector.shape_cast %15 : vector<1x8x4xbf16> to vector<8x4xbf16>
    %cst_16 = arith.constant dense<0.000000e+00> : vector<8x256xf32>
    %17 = tpu.matmul %16, %14, %cst_16 {dimension_numbers = #tpu.dot_dimension_numbers<[1], [0], [0], [1], [0, 0, 1, 1], [], []>} : vector<8x4xbf16>, vector<4x256xbf16>, vector<8x256xf32> -> vector<8x256xf32>
    %18 = arith.addf %12, %17 : vector<8x256xf32>
    %c0_17 = arith.constant 0 : index
    %c0_18 = arith.constant 0 : index
    %c17 = arith.constant 17 : index
    %19 = vector.load %arg2[%c0_17, %c0_18, %c17] : memref<1x4x384xbf16, #tpu.memory_space<vmem>>, vector<1x4x256xbf16>
    %20 = vector.shape_cast %19 : vector<1x4x256xbf16> to vector<4x256xbf16>
    %c3 = arith.constant 3 : index
    %c0_19 = arith.constant 0 : index
    %c0_20 = arith.constant 0 : index
    %21 = vector.load %arg3[%c3, %c0_19, %c0_20] : memref<4x8x4xbf16, #tpu.memory_space<vmem>>, vector<1x8x4xbf16>
    %22 = vector.shape_cast %21 : vector<1x8x4xbf16> to vector<8x4xbf16>
    %cst_21 = arith.constant dense<0.000000e+00> : vector<8x256xf32>
    %23 = tpu.matmul %22, %20, %cst_21 {dimension_numbers = #tpu.dot_dimension_numbers<[1], [0], [0], [1], [0, 0, 1, 1], [], []>} : vector<8x4xbf16>, vector<4x256xbf16>, vector<8x256xf32> -> vector<8x256xf32>
    %24 = arith.addf %18, %23 : vector<8x256xf32>
    %25 = arith.truncf %24 : vector<8x256xf32> to vector<8x256xbf16>
    %c0_22 = arith.constant 0 : index
    %c0_23 = arith.constant 0 : index
    %c0_24 = arith.constant 0 : index
    %26 = vector.load %arg5[%c0_22, %c0_23, %c0_24] : memref<1x8x256xbf16, #tpu.memory_space<vmem>>, vector<1x8x256xbf16>
    %27 = vector.shape_cast %26 : vector<1x8x256xbf16> to vector<8x256xbf16>
    %28 = vector.shape_cast %25 : vector<8x256xbf16> to vector<1x8x256xbf16>
    tpu.vector_store %arg5[%c0_22, %c0_23, %c0_24], %28 {strides = array<i32>} : memref<1x8x256xbf16, #tpu.memory_space<vmem>>, vector<1x8x256xbf16>,
    %c0_25 = arith.constant 0 : index
    %c0_26 = arith.constant 0 : index
    %29 = vector.load %arg4[%c0_25, %c0_26] : memref<1x256xf32, #tpu.memory_space<vmem>>, vector<1x256xf32>
    %30 = vector.broadcast %29 : vector<1x256xf32> to vector<8x256xf32>
    %31 = arith.mulf %24, %30 : vector<8x256xf32>
    %cst_27 = arith.constant dense<0.000000e+00> : vector<8xf32>
    %32 = vector.multi_reduction <add>, %31, %cst_27 [1] : vector<8x256xf32> to vector<8xf32>
    %33 = vector.shape_cast %32 : vector<8xf32> to vector<8x1xf32>
    %c0_28 = arith.constant 0 : index
    %c0_29 = arith.constant 0 : index
    %c0_30 = arith.constant 0 : index
    %34 = vector.load %arg6[%c0_28, %c0_29, %c0_30] : memref<1x8x1xf32, #tpu.memory_space<vmem>>, vector<1x8x1xf32>
    %35 = vector.shape_cast %34 : vector<1x8x1xf32> to vector<8x1xf32>
    %36 = vector.shape_cast %33 : vector<8x1xf32> to vector<1x8x1xf32>
    tpu.vector_store %arg6[%c0_28, %c0_29, %c0_30], %36 {strides = array<i32>} : memref<1x8x1xf32, #tpu.memory_space<vmem>>, vector<1x8x1xf32>,
    %37 = arith.mulf %31, %24 : vector<8x256xf32>
    %cst_31 = arith.constant dense<0.000000e+00> : vector<8xf32>
    %38 = vector.multi_reduction <add>, %37, %cst_31 [1] : vector<8x256xf32> to vector<8xf32>
    %39 = vector.shape_cast %38 : vector<8xf32> to vector<8x1xf32>
    %c0_32 = arith.constant 0 : index
    %c0_33 = arith.constant 0 : index
    %c0_34 = arith.constant 0 : index
    %40 = vector.load %arg7[%c0_32, %c0_33, %c0_34] : memref<1x8x1xf32, #tpu.memory_space<vmem>>, vector<1x8x1xf32>
    %41 = vector.shape_cast %40 : vector<1x8x1xf32> to vector<8x1xf32>
    %42 = vector.shape_cast %39 : vector<8x1xf32> to vector<1x8x1xf32>
    tpu.vector_store %arg7[%c0_32, %c0_33, %c0_34], %42 {strides = array<i32>} : memref<1x8x1xf32, #tpu.memory_space<vmem>>, vector<1x8x1xf32>,
    return
  }
  func.func @transform_0(%arg0: i32, %arg1: i32) -> (i32, i32, i32) {
    %c0_i32 = arith.constant 0 : i32
    %c0_i32_0 = arith.constant 0 : i32
    %c0_i32_1 = arith.constant 0 : i32
    return %arg0, %c0_i32, %c0_i32_0 : i32, i32, i32
  }
  func.func @transform_1(%arg0: i32, %arg1: i32) -> (i32, i32, i32) {
    %c0_i32 = arith.constant 0 : i32
    %c0_i32_0 = arith.constant 0 : i32
    %c0_i32_1 = arith.constant 0 : i32
    return %c0_i32, %arg1, %c0_i32_0 : i32, i32, i32
  }
  func.func @transform_2(%arg0: i32, %arg1: i32) -> (i32, i32) {
    %c0_i32 = arith.constant 0 : i32
    %c0_i32_0 = arith.constant 0 : i32
    %c0_i32_1 = arith.constant 0 : i32
    return %c0_i32, %c0_i32_0 : i32, i32
  }
  func.func @transform_3(%arg0: i32, %arg1: i32) -> (i32, i32, i32) {
    %c0_i32 = arith.constant 0 : i32
    %c0_i32_0 = arith.constant 0 : i32
    return %arg0, %arg1, %c0_i32 : i32, i32, i32
  }
  func.func @transform_4(%arg0: i32, %arg1: i32) -> (i32, i32, i32) {
    %c0_i32 = arith.constant 0 : i32
    %c0_i32_0 = arith.constant 0 : i32
    return %arg0, %arg1, %c0_i32 : i32, i32, i32
  }
  func.func @transform_5(%arg0: i32, %arg1: i32) -> (i32, i32, i32) {
    %c0_i32 = arith.constant 0 : i32
    %c0_i32_0 = arith.constant 0 : i32
    return %arg0, %arg1, %c0_i32 : i32, i32, i32
  }
}

</mosaic_0001>

<bundles_post_ra>
// kernel: tpu_custom_call.1
= control target key start
LH: loop header
LB: loop body
LE: loop exit
PB: predicated region body
PF: predicated region fallthrough
CT: control target
= control target key end

     0   :  { %11 = vsyncpa [#allocation3], 0  ;;  %s1055_s0 = inlined_call_operand.vmem [shape: bf16[2,4,384], index: 0, kind: input, shape index: {}]   ;;  %s1056_s1 = inlined_call_operand.vmem [shape: bf16[4,8,4], index: 1, kind: input, shape index: {}]   ;;  %s1057_s2 = inlined_call_operand.vmem [shape: f32[1,256], index: 2, kind: input, shape index: {}]   ;;  %s1058_s3 = inlined_call_operand.hbm [shape: bf16[2,8,256], index: 3, kind: output, shape index: {0}]   ;;  %s1059_s4 = inlined_call_operand.vmem [shape: f32[2,8,1], index: 4, kind: output, shape index: {1}]   ;;  %s1060_s5 = inlined_call_operand.vmem [shape: f32[2,8,1], index: 5, kind: output, shape index: {2}]  }
   0x1   :  { %13 = vsyncpa [#allocation3 + $0x1], 0  ;;  %s908_s18 = smov 0   ;;  %s910_s19 = smov 0  }
   0x2   :  { %s912_s20 = smov 0   ;;  %s914_s21 = smov 0  }
   0x3   :  { %s916_s22 = smov 0   ;;  %s918_s23 = smov 0  }
   0x4 LB: > { %s709_s24 = sadd.s32 4294967295, %s873_s23   ;;  %s710_s25 = sadd.s32 4294967294, %s873_s23   ;;  %s873_s23 = sphi %s918_s23, %s19_s23   ;;  %s869_s22 = sphi %s916_s22, %s1067_s22   ;;  %s865_s21 = sphi %s914_s21, %s1066_s21   ;;  %s861_s20 = sphi %s912_s20, %s1065_s20   ;;  %s857_s19 = sphi %s910_s19, %s1064_s19   ;;  %s853_s18 = sphi %s908_s18, %s1063_s18  }
   0x5   : > { %s31_s26 = sadd.s32 1, %s869_s22  ;;  %s113_s27 = sadd.s32 1, %s861_s20 }
   0x6   : > { %p33_p0 = scmp.ge.s32.totalorder %s31_s26, 2  ;;  %p123_p1 = scmp.ne.s32.totalorder %s861_s20, %s857_s19 }
   0x7   : > { %p124_p2 = scmp.eq.s32.totalorder %s709_s24, 1  ;;  %p129_p3 = scmp.ne.s32.totalorder %s857_s19, %s853_s18 }
   0x8   : > { %s1069_s26 = smov (%p33_p0, %s31_s26), 0  ;;  %p130_p5 = scmp.eq.s32.totalorder %s710_s25, 1 }
   0x9   : > { %p948_p4 = por %p124_p2, %p123_p1  ;;  %s108_s29 = ssub.s32 %s869_s22, %s1069_s26 }
   0xa   : > { %p714_p6 = scmp.ge.s32.totalorder %s873_s23, 1  ;;  %p111_p7 = scmp.eq.s32.totalorder %s108_s29, 0 }
   0xb   : > { %p955_p8 = por %p130_p5, %p129_p3  ;;  %p222_p9 = scmp.lt.s32.totalorder %s873_s23, 3 }
   0xc   : > { %s961_s6 = scalar_select %p111_p7, %s861_s20, %s113_s27  }
   0xd   : > { %p223_p10 = pnand %p714_p6, %p222_p9 }
   0xe   : > { %p268_p11 = scmp.lt.s32.totalorder (!%p223_p10), %s865_s21, 1  ;;  %s875_s12 = smov (!%p223_p10), 127  }
   0xf   : > { %226 = sbr.rel (%p223_p10) target bundleno = 442 (0x1ba), region = 32  ;;  %s876_s13 = smov (!%p223_p10), 112  }
  0x10   : > { %s877_s14 = smov (!%p223_p10), 111   ;;  %s247_s9 = sand.u32 (!%p223_p10), 1, %s857_s19  }
  0x11   : > { %s735_s10 = sshll.u32 (!%p223_p10), %s865_s21, 3  ;;  %s524_s25 = scalar_lea.sflag (!%p223_p10), [#allocation3], %s247_s9 }
  0x12   : > { %s551_s16 = scalar_lea.hbm (!%p223_p10), %s1058_s3, %s735_s10 }
  0x13   : > { %s555_s24 = sshll.u32 (!%p223_p10), %s551_s16, 4  ;;  %s556_s24 = int_to_ptr.hbm [resolvable:$true] %s555_s24 }
  0x14   : > { %s965_s7 = scalar_select %p268_p11, %s865_s21, 1  ;;  %vm318_vm0 = vcmask 1041408   ;;  %v293_v17 = vld [vmem:[%s1056_s1] sm:$0xf]  ;;  %vm314_vm1 = vcmask 31744   ;;  %vm311_vm2 = vcmask 1039360  }
  0x15   : > { %vm462_vm3 = vcmask 908288   ;;  %v719_v28 = vld [vmem:[%s1056_s1 + $0x4] sm:$0xf]  ;;  %v727_v30 = vld [vmem:[%s1056_s1 + $0xc] sm:$0xf]  ;;  %vm405_vm4 = vcmask 916480  }
  0x16   : > { %s736_s8 = smul.u32 6, %s965_s7  ;;  %v724_v41 = vld [vmem:[%s1056_s1 + $0x8] sm:$0xf]  ;;  %v504_v53 = vld [vmem:[%s1057_s2] sm:$0x3]  ;;  %s809_s27 = sshra.s32 %s556_s24, 4  ;;  %s810_s27 = int_to_ptr.hbm [resolvable:$true] %s809_s27 }
  0x17   : > { %v506_v60 = vperm.slane %v504_v53, 0  ;;  %v507_v61 = vperm.slane %v504_v53, 1  ;;  %s811_s29 = scalar_lea.hbm %s810_s27, 8  ;;  %p816_p1 = scmp.lt.s32.totalorder %s810_s27, %s1058_s3 }
  0x18   : > { %s272_s11 = scalar_lea.vmem %s1055_s0, %s736_s8  ;;  %p812_p12 = scmp.ne.s32.totalorder %s810_s27, %s811_s29 }
  0x19   : > { %v294_v0 = vld [vmem:[%s272_s11] sm:$0x3f] }
  0x1a   : > { %298 = vst [vmem:[#allocation1] ss:$4 sm:$0xff] %v294_v0  ;;  %v292_v1 = vld [vmem:[%s272_s11] sm:$0xf]  ;;  %p813_p13 = pnand %p812_p12, %p948_p4 }
  0x1b   : > { %v388_v5 = vld [vmem:[%s272_s11] sm:$0x3f] }
  0x1c   : > { %v445_v8 = vld [vmem:[%s272_s11] sm:$0x3f]  ;;  %p814_p0 = pneg %p813_p13  ;;  %s815_s11 = scalar_lea.hbm %s1058_s3, 16 }
  0x1d   : > { %p817_p2 = scmp.lt.s32.totalorder %s815_s11, %s811_s29 }
  0x1f   : > { %p818_p3 = por %p817_p2, %p816_p1 }
  0x21   : > { %v299_v2 = vld.sshfl [vmem:[#allocation1] sm:$0xff pattern:$0x73625140]  ;;  %v303_v3 = vld.sshfl [vmem:[#allocation1 + $0x10] sm:$0xff pattern:$0x73625140]  ;;  %p819_p5 = pnand %p818_p3, %p814_p0 }
  0x22   : > { %305 = vrot.lane.b32.xlu0 %v299_v2, %s875_s12  ;;  %309 = vrot.lane.b32.xlu1 %v303_v3, %s875_s12  ;;  %v301_v4 = vld.sshfl [vmem:[#allocation1 + $0x8] sm:$0xff pattern:$0x73625140] }
  0x23   : > { %352 = vst [vmem:[#allocation1] ss:$4 sm:$0xff] %v292_v1 }
  0x2a   : > { %307 = vrot.lane.b32.xlu0 %v301_v4, %s875_s12  ;;  %v353_v6 = vld.sshfl [vmem:[#allocation1] sm:$0xff pattern:$0x73625140]  ;;  %v354_v7 = vld.sshfl [vmem:[#allocation1 + $0x8] sm:$0xff pattern:$0x73625140] }
  0x2b   : > { %392 = vst [vmem:[#allocation1] ss:$4 sm:$0xff] %v388_v5  ;;  %v358_v15 = vsel %vm318_vm0, %v353_v6, 0  ;;  %v360_v16 = vsel %vm318_vm0, %v354_v7, 0 }
  0x2c   : > { %369 = vmatpush.bf16.msra.mxu2 %v358_v15  ;;  %382 = vmatpush.bf16.msra.mxu3 %v360_v16 }
  0x2f   : > { %722 = vmatmul.msk.bf16.vlgmr.msra.gmra.mxu2 %vm314_vm1, %v293_v17  ;;  %723 = vmatmul.msk.bf16.vlgmr.msra.gmra.mxu3 %vm314_vm1, %v293_v17 }
  0x32   : > { %v393_v9 = vld.sshfl [vmem:[#allocation1] sm:$0xff pattern:$0x73625140]  ;;  %v395_v10 = vld.sshfl [vmem:[#allocation1 + $0x8] sm:$0xff pattern:$0x73625140] }
  0x33   : > { %v397_v11 = vld.sshfl [vmem:[#allocation1 + $0x10] sm:$0xff pattern:$0x73625140]  ;;  %399 = vrot.lane.b32.xlu0 %v393_v9, %s876_s13 }
  0x34   : > { %449 = vst [vmem:[#allocation1] ss:$4 sm:$0xff] %v445_v8 }
  0x3b   : > { %v450_v12 = vld.sshfl [vmem:[#allocation1] sm:$0xff pattern:$0x73625140]  ;;  %v452_v13 = vld.sshfl [vmem:[#allocation1 + $0x8] sm:$0xff pattern:$0x73625140] }
  0x3c   : > { %456 = vrot.lane.b32.xlu1 %v450_v12, %s877_s14  ;;  %458 = vrot.lane.b32.xlu2 %v452_v13, %s877_s14  ;;  %v454_v14 = vld.sshfl [vmem:[#allocation1 + $0x10] sm:$0xff pattern:$0x73625140] }
  0x44   : > { %401 = vrot.lane.b32.xlu1 %v395_v10, %s876_s13  ;;  %460 = vrot.lane.b32.xlu2 %v454_v14, %s877_s14 }
  0x4c   : > { %403 = vrot.lane.b32.xlu2 %v397_v11, %s876_s13  ;;  %s715_s13 = sshll.u32 %s247_s9, 3 }
  0x4d   : > { %s249_s21 = scalar_lea.vmem [#allocation2], %s715_s13 }
  0x4e   : > { %s1011_s17 = sshll.u32 %s249_s21, 4  ;;  %s554_s17 = int_to_ptr.vmem [resolvable:$true] %s1011_s17 }
  0x94   : > { %v306_v18 = vpop.permute.xlu0 %305  ;;  %v310_v20 = vpop.permute.xlu1 %309 }
  0x96   : > { %v459_v19 = vpop.permute.xlu2 %458 }
  0x9c   : > { %v308_v21 = vpop.permute.xlu0 %307 }
  0x9d   : > { %v312_v22 = vsel %vm311_vm2, %v306_v18, %v308_v21  ;;  %v313_v23 = vsel %vm311_vm2, %v308_v21, %v310_v20 }
  0x9e   : > { %v461_v24 = vpop.permute.xlu2 %460  ;;  %v320_v25 = vsel %vm318_vm0, %v312_v22, 0  ;;  %v323_v26 = vsel %vm318_vm0, %v313_v23, 0 }
  0x9f   : > { %332 = vmatpush.bf16.msra.mxu0 %v320_v25  ;;  %345 = vmatpush.bf16.msra.mxu1 %v323_v26  ;;  %v464_v27 = vsel %vm462_vm3, %v459_v19, %v461_v24 }
  0xa0   : > { %v472_v29 = vsel %vm318_vm0, %v464_v27, 0 }
  0xa1   : > { %494 = vmatpush.bf16.msrb.mxu3 %v472_v29 }
  0xa2   : > { %720 = vmatmul.msk.bf16.vlgmr.msra.gmra.mxu0 %vm314_vm1, %v719_v28  ;;  %721 = vmatmul.msk.bf16.vlgmr.msra.gmra.mxu1 %vm314_vm1, %v719_v28 }
  0xa4   : > { %729 = vmatmul.msk.bf16.vlgmr.msrb.gmra.mxu3 %vm314_vm1, %v727_v30 }
  0xa5   : > { %v400_v34 = vpop.permute.xlu0 %399 }
  0xa6   : > { %v404_v35 = vpop.permute.xlu2 %403 }
  0xae   : > { %v457_v31 = vpop.permute.xlu1 %456 }
  0xaf   : > { %v463_v32 = vsel %vm462_vm3, %v457_v31, %v459_v19 }
  0xb0   : > { %v469_v33 = vsel %vm318_vm0, %v463_v32, 0 }
  0xb1   : > { %481 = vmatpush.bf16.msrb.mxu2 %v469_v33 }
  0xb2   : > { %v371_v42 = vpop.f32.mrf.mxu2  ;;  %v384_v43 = vpop.f32.mrf.mxu3 }
  0xb4   : > { %728 = vmatmul.msk.bf16.vlgmr.msrb.gmra.mxu2 %vm314_vm1, %v727_v30 }
  0xb6   : > { %v402_v36 = vpop.permute.xlu1 %401 }
  0xb7   : > { %v406_v37 = vsel %vm405_vm4, %v400_v34, %v402_v36  ;;  %v407_v38 = vsel %vm405_vm4, %v402_v36, %v404_v35 }
  0xb8   : > { %v412_v39 = vsel %vm318_vm0, %v406_v37, 0  ;;  %v415_v40 = vsel %vm318_vm0, %v407_v38, 0 }
  0xb9   : > { %424 = vmatpush.bf16.msrb.mxu0 %v412_v39  ;;  %437 = vmatpush.bf16.msrb.mxu1 %v415_v40 }
  0xba   : > { %v373_v44 = vpop.f32.mrf.mxu2  ;;  %v386_v45 = vpop.f32.mrf.mxu3 }
  0xbc   : > { %725 = vmatmul.msk.bf16.vlgmr.msrb.gmra.mxu0 %vm314_vm1, %v724_v41  ;;  %726 = vmatmul.msk.bf16.vlgmr.msrb.gmra.mxu1 %vm314_vm1, %v724_v41 }
 0x11f   : > { %v334_v46 = vpop.f32.mrf.mxu0  ;;  %v347_v47 = vpop.f32.mrf.mxu1 }
 0x120   : > { %v372_v54 = vadd.f32 %v371_v42, %v334_v46  ;;  %v385_v55 = vadd.f32 %v384_v43, %v347_v47 }
 0x127   : > { %v336_v48 = vpop.f32.mrf.mxu0  ;;  %v349_v49 = vpop.f32.mrf.mxu1 }
 0x128   : > { %v496_v50 = vpop.f32.mrf.mxu3 }
 0x130   : > { %v498_v51 = vpop.f32.mrf.mxu3 }
 0x137   : > { %v483_v52 = vpop.f32.mrf.mxu2 }
 0x139   : > { %v426_v56 = vpop.f32.mrf.mxu0  ;;  %v439_v57 = vpop.f32.mrf.mxu1 }
 0x13a   : > { %v443_v58 = vadd.f32 %v426_v56, %v372_v54  ;;  %v444_v59 = vadd.f32 %v439_v57, %v385_v55 }
 0x13c   : > { %v500_v62 = vadd.f32 %v483_v52, %v443_v58  ;;  %v501_v63 = vadd.f32 %v496_v50, %v444_v59 }
 0x13e   : > { %v502_v0 = vpack.c.bf16 %v501_v63, %v500_v62  ;;  %v510_v1 = vmul.f32 %v506_v60, %v500_v62  ;;  %v511_v2 = vmul.f32 %v507_v61, %v501_v63 }
 0x13f   : > { %v485_v3 = vpop.f32.mrf.mxu2 }
 0x140   : > { %v512_v4 = vadd.f32 %v511_v2, %v510_v1  ;;  %v517_v5 = vmul.f32 %v510_v1, %v500_v62  ;;  %v518_v6 = vmul.f32 %v511_v2, %v501_v63  ;;  %503 = vst [vmem:[%s249_s21] sm:$0xff] %v502_v0 }
 0x141   : > { %v428_v7 = vpop.f32.mrf.mxu0  ;;  %v441_v8 = vpop.f32.mrf.mxu1 }
 0x142   : > { %822 = shalt.err (!%p819_p5)
}
 0x143   : > { %737 = dma.vmem_to_hbm [thread:$0]  (%p948_p4), %s554_s17, 128, %s556_s24, %s524_s25   ;;  %513 = vadd.xlane.f32.xlu0 %v512_v4  ;;  %v519_v9 = vadd.f32 %v518_v6, %v517_v5  ;;  %vm515_vm5 = vcmask 7168  }
 0x144   : > { %s717_s9 = sshll.u32 %s965_s7, 3 }
 0x145   : > { %520 = vadd.xlane.f32.xlu1 %v519_v9  ;;  %s283_s16 = scalar_lea.vmem %s1059_s4, %s717_s9  ;;  %s290_s29 = scalar_lea.vmem %s1060_s5, %s717_s9 }
 0x1b6   : > { %v514_v10 = vpop.xlane.xlu0 %513 }
 0x1b7   : > { %516 = vst.msk [vmem:[%s283_s16] sm:$0xff] %vm515_vm5, %v514_v10 }
 0x1b8   : > { %v521_v11 = vpop.xlane.xlu1 %520 }
 0x1b9   : > { %522 = vst.msk [vmem:[%s290_s29] sm:$0xff] %vm515_vm5, %v521_v11 }
 0x1ba PF: > { %p743_p4 = scmp.ge.s32.totalorder %s873_s23, 2  ;;  %s573_s28 = sand.u32 1, %s853_s18  }
 0x1bb   : > { %s574_s7 = scalar_lea.sflag [#allocation3], %s573_s28 }
 0x1bc   : > { %p740_p6 = pnand %p743_p4, %p955_p8 }
 0x1be   : > { %p741_p7 = pneg %p740_p6 }
 0x1c0   : > { %848 = dma.done.wait (%p741_p7), %s574_s7, 128  }
 0x1c1   : > { %850 = vsyncadd (%p741_p7), %s574_s7, 4294967168  ;;  %s19_s23 = sadd.s32 1, %s873_s23   ;;  %s1063_s18 = smov %s857_s19 }
 0x1c2   : > { %p16_p9 = scmp.ge.s32.totalorder %s19_s23, 4   ;;  %s1064_s19 = smov %s861_s20 }
 0x1c3   : > { %s1065_s20 = smov %s961_s6  ;;  %s1066_s21 = smov %s869_s22 }
 0x1c4   : > { %s1067_s22 = smov %s1069_s26  ;;  %18 = sbr.rel (!%p16_p9) target bundleno = 4 (0x4), region = 97 }
 0x1c9   :  { %600 = vsyncpa [#allocation3], 1 }
 0x1ca   :  { %602 = vsyncpa [#allocation3 + $0x1], 1 }

</bundles_post_ra>
